<compile_context>
chip_gen: v7x
topology: tpu7x:2x2x1
jax: 0.10.0
libtpu: 0.0.40
codegen_flags: <defaults>
</compile_context>

<pallas_src>
import functools

import jax
import jax.numpy as jnp
from jax.experimental import pallas as pl
from jax.experimental.pallas import tpu as pltpu

HIDDEN = 15            # logical hidden width of fc1/fc2 from the module
LANES = 128
HPAD = 128             # lane-dense padded hidden width
_NEG_BIG = -1e30       # bias value for padded action lanes (exp -> 0 under softmax)
DEFAULT_TILE_B = 4096  # batch rows per grid step (multiple of 8)


def _round_up(n, m):
    return ((n + m - 1) // m) * m


def _mlp_softmax_kernel(x_ref, w1_ref, b1_ref, w2_ref, b2_ref, w3_ref, b3_ref, o_ref):
    x = x_ref[...]

    # fc1 + ReLU
    h1 = jnp.dot(x, w1_ref[...], preferred_element_type=jnp.float32) + b1_ref[...]
    h1 = jnp.maximum(h1, 0.0)

    # fc2 + ReLU
    h2 = jnp.dot(h1, w2_ref[...], preferred_element_type=jnp.float32) + b2_ref[...]
    h2 = jnp.maximum(h2, 0.0)

    # fc3 (padded action lanes get bias = -1e30 -> exp underflows to exactly 0)
    logits = jnp.dot(h2, w3_ref[...], preferred_element_type=jnp.float32) + b3_ref[...]

    # numerically stable softmax over the last (lane) dim
    m = jnp.max(logits, axis=-1, keepdims=True)        # only remaining XLU reduce
    e = jnp.exp(logits - m)                            # padded lanes are exactly 0

    # Row sum on the MXU (idle slot) instead of an XLU lane-reduce; the ones-matmul
    # broadcasts the sum into every lane, so no broadcast-back is needed either.
    apad = e.shape[-1]
    denom = jnp.dot(e, jnp.ones((apad, apad), jnp.float32),
                    preferred_element_type=jnp.float32)

    a = o_ref.shape[-1]
    # Exact division (approx reciprocal broke the rows-sum-to-1 property).
    o_ref[...] = e[:, :a] / denom[:, :a]


def pad_params(params):
    """One-time lane-dense padding of the module parameters.

    Call once (e.g. after init / after each optimizer step), NOT per forward call.
    Zero padding keeps the math identical for hidden lanes (they stay 0 through
    ReLU); padded action biases get -1e30 so they vanish under the softmax.
    """
    S = params["w1"].shape[0]
    A = params["w3"].shape[1]
    APAD = _round_up(A, LANES)
    f32 = jnp.float32
    return {
        "w1": jnp.zeros((S, HPAD), f32).at[:, :HIDDEN].set(params["w1"]),
        "b1": jnp.zeros((1, HPAD), f32).at[:, :HIDDEN].set(params["b1"]),
        "w2": jnp.zeros((HPAD, HPAD), f32).at[:HIDDEN, :HIDDEN].set(params["w2"]),
        "b2": jnp.zeros((1, HPAD), f32).at[:, :HIDDEN].set(params["b2"]),
        "w3": jnp.zeros((HPAD, APAD), f32).at[:HIDDEN, :A].set(params["w3"]),
        "b3": jnp.full((1, APAD), _NEG_BIG, f32).at[:, :A].set(params["b3"]),
    }


def nn_forward(x, padded, action_size, tile_b=DEFAULT_TILE_B):
    """Pallas forward pass of the NN module.

    x:       [B, state_size] float32
    padded:  output of pad_params()
    returns: [B, action_size] float32 softmax probabilities (exactly that shape,
             no host-side padding or slicing)
    """
    B, S = x.shape
    A = action_size
    HP = padded["w1"].shape[1]
    APAD = padded["w3"].shape[1]

    # Batch tiling without host-side padding: the block either spans the full
    # batch (any B, grid=1) or is a multiple of 8; a ragged last block is
    # read-padded / write-masked by Pallas and its garbage rows are row-isolated.
    tb = B if B <= tile_b else tile_b
    grid = (pl.cdiv(B, tb),)

    const = lambda i: (0, 0)  # weights/biases resident in VMEM across all tiles

    out = pl.pallas_call(
        _mlp_softmax_kernel,
        out_shape=jax.ShapeDtypeStruct((B, A), jnp.float32),
        grid=grid,
        in_specs=[
            pl.BlockSpec((tb, S), lambda i: (i, 0)),   # x: streamed per batch tile
            pl.BlockSpec((S, HP), const),              # w1
            pl.BlockSpec((1, HP), const),              # b1
            pl.BlockSpec((HP, HP), const),             # w2
            pl.BlockSpec((1, HP), const),              # b2
            pl.BlockSpec((HP, APAD), const),           # w3
            pl.BlockSpec((1, APAD), const),            # b3
        ],
        out_specs=pl.BlockSpec((tb, A), lambda i: (i, 0)),   # native-width output
        compiler_params=pltpu.CompilerParams(
            dimension_semantics=("parallel",)),
    )(x, padded["w1"], padded["b1"], padded["w2"], padded["b2"],
      padded["w3"], padded["b3"])
    return out


def nn_forward_ref(x, params):
    """Pure-JAX reference for correctness checking."""
    h1 = jnp.maximum(x @ params["w1"] + params["b1"], 0.0)
    h2 = jnp.maximum(h1 @ params["w2"] + params["b2"], 0.0)
    logits = h2 @ params["w3"] + params["b3"]
    return jax.nn.softmax(logits, axis=-1)


def init_params(key, state_size, action_size, hidden=HIDDEN):
    """Deterministic parameter init mirroring the PyTorch module:
    fc1/fc2 weights xavier-normal, fc3 weight + all biases PyTorch-Linear-default
    uniform(-1/sqrt(fan_in), 1/sqrt(fan_in)). Weights stored as [in, out]."""
    k = jax.random.split(key, 6)

    def xavier_normal(rng, fan_in, fan_out):
        std = (2.0 / (fan_in + fan_out)) ** 0.5
        return std * jax.random.normal(rng, (fan_in, fan_out), dtype=jnp.float32)

    def uniform_fanin(rng, shape, fan_in):
        bound = 1.0 / (fan_in ** 0.5)
        return jax.random.uniform(rng, shape, jnp.float32, -bound, bound)

    return {
        "w1": xavier_normal(k[0], state_size, hidden),
        "b1": uniform_fanin(k[1], (1, hidden), state_size),
        "w2": xavier_normal(k[2], hidden, hidden),
        "b2": uniform_fanin(k[3], (1, hidden), hidden),
        "w3": uniform_fanin(k[4], (hidden, action_size), hidden),
        "b3": uniform_fanin(k[5], (1, action_size), hidden),
    }


if __name__ == "__main__":
    # Small shapes consistent with the module (tic-tac-toe-style DQN):
    # state_size=9, action_size=9, batch=2.
    state_size, action_size, batch = 9, 9, 2

    key = jax.random.PRNGKey(0)
    pkey, xkey = jax.random.split(key)
    params = init_params(pkey, state_size, action_size)
    padded = pad_params(params)          # one-time padding, outside the per-step call

    x = jax.random.normal(xkey, (batch, state_size), dtype=jnp.float32)

    fwd = jax.jit(functools.partial(nn_forward, action_size=action_size))
    probs = jax.block_until_ready(fwd(x, padded))

    # sanity: shape, rows of a softmax sum to 1, and match the pure-JAX reference
    assert probs.shape == (batch, action_size)
    row_sums = jnp.sum(probs, axis=-1)
    assert bool(jnp.all(jnp.abs(row_sums - 1.0) < 1e-4))

    ref = nn_forward_ref(x, params)
    assert bool(jnp.all(jnp.abs(probs - ref) < 1e-4))

    print("KERNEL_OK")
</pallas_src>

<mosaic_0001>
module attributes {stable_mosaic.version = 11 : i64} {
  func.func @_mlp_softmax_kernel(%arg0: i32, %arg1: memref<2x9xf32, #tpu.memory_space<vmem>>, %arg2: memref<9x128xf32, #tpu.memory_space<vmem>>, %arg3: memref<1x128xf32, #tpu.memory_space<vmem>>, %arg4: memref<128x128xf32, #tpu.memory_space<vmem>>, %arg5: memref<1x128xf32, #tpu.memory_space<vmem>>, %arg6: memref<128x128xf32, #tpu.memory_space<vmem>>, %arg7: memref<1x128xf32, #tpu.memory_space<vmem>>, %arg8: memref<2x9xf32, #tpu.memory_space<vmem>>) attributes {dimension_semantics = [#tpu.dimension_semantics<parallel>], iteration_bounds = array<i64: 1>, scalar_prefetch = 0 : i64, scratch_operands = 0 : i64, tpu.core_type = #tpu.core_type<tc>, window_params = [{transform_indices = @transform_0, window_bounds = array<i64: 2, 9>}, {pipeline_mode = #tpu.pipeline_mode<synchronous>, transform_indices = @transform_1, window_bounds = array<i64: 9, 128>}, {pipeline_mode = #tpu.pipeline_mode<synchronous>, transform_indices = @transform_2, window_bounds = array<i64: 1, 128>}, {pipeline_mode = #tpu.pipeline_mode<synchronous>, transform_indices = @transform_3, window_bounds = array<i64: 128, 128>}, {pipeline_mode = #tpu.pipeline_mode<synchronous>, transform_indices = @transform_4, window_bounds = array<i64: 1, 128>}, {pipeline_mode = #tpu.pipeline_mode<synchronous>, transform_indices = @transform_5, window_bounds = array<i64: 128, 128>}, {pipeline_mode = #tpu.pipeline_mode<synchronous>, transform_indices = @transform_6, window_bounds = array<i64: 1, 128>}, {transform_indices = @transform_7, window_bounds = array<i64: 2, 9>}]} {
    %c0 = arith.constant 0 : index
    %c0_0 = arith.constant 0 : index
    %0 = vector.load %arg1[%c0, %c0_0] : memref<2x9xf32, #tpu.memory_space<vmem>>, vector<2x9xf32>
    %c0_1 = arith.constant 0 : index
    %c0_2 = arith.constant 0 : index
    %1 = vector.load %arg2[%c0_1, %c0_2] : memref<9x128xf32, #tpu.memory_space<vmem>>, vector<9x128xf32>
    %cst = arith.constant dense<0.000000e+00> : vector<2x128xf32>
    %2 = tpu.matmul %0, %1, %cst {dimension_numbers = #tpu.dot_dimension_numbers<[1], [0], [0], [1], [0, 0, 1, 1], [], []>} : vector<2x9xf32>, vector<9x128xf32>, vector<2x128xf32> -> vector<2x128xf32>
    %c0_3 = arith.constant 0 : index
    %c0_4 = arith.constant 0 : index
    %3 = vector.load %arg3[%c0_3, %c0_4] : memref<1x128xf32, #tpu.memory_space<vmem>>, vector<1x128xf32>
    %4 = vector.broadcast %3 : vector<1x128xf32> to vector<2x128xf32>
    %5 = arith.addf %2, %4 : vector<2x128xf32>
    %cst_5 = arith.constant 0.000000e+00 : f32
    %6 = vector.broadcast %cst_5 : f32 to vector<2x128xf32>
    %7 = arith.maximumf %5, %6 : vector<2x128xf32>
    %c0_6 = arith.constant 0 : index
    %c0_7 = arith.constant 0 : index
    %8 = vector.load %arg4[%c0_6, %c0_7] : memref<128x128xf32, #tpu.memory_space<vmem>>, vector<128x128xf32>
    %cst_8 = arith.constant dense<0.000000e+00> : vector<2x128xf32>
    %9 = tpu.matmul %7, %8, %cst_8 {dimension_numbers = #tpu.dot_dimension_numbers<[1], [0], [0], [1], [0, 0, 1, 1], [], []>} : vector<2x128xf32>, vector<128x128xf32>, vector<2x128xf32> -> vector<2x128xf32>
    %c0_9 = arith.constant 0 : index
    %c0_10 = arith.constant 0 : index
    %10 = vector.load %arg5[%c0_9, %c0_10] : memref<1x128xf32, #tpu.memory_space<vmem>>, vector<1x128xf32>
    %11 = vector.broadcast %10 : vector<1x128xf32> to vector<2x128xf32>
    %12 = arith.addf %9, %11 : vector<2x128xf32>
    %cst_11 = arith.constant 0.000000e+00 : f32
    %13 = vector.broadcast %cst_11 : f32 to vector<2x128xf32>
    %14 = arith.maximumf %12, %13 : vector<2x128xf32>
    %c0_12 = arith.constant 0 : index
    %c0_13 = arith.constant 0 : index
    %15 = vector.load %arg6[%c0_12, %c0_13] : memref<128x128xf32, #tpu.memory_space<vmem>>, vector<128x128xf32>
    %cst_14 = arith.constant dense<0.000000e+00> : vector<2x128xf32>
    %16 = tpu.matmul %14, %15, %cst_14 {dimension_numbers = #tpu.dot_dimension_numbers<[1], [0], [0], [1], [0, 0, 1, 1], [], []>} : vector<2x128xf32>, vector<128x128xf32>, vector<2x128xf32> -> vector<2x128xf32>
    %c0_15 = arith.constant 0 : index
    %c0_16 = arith.constant 0 : index
    %17 = vector.load %arg7[%c0_15, %c0_16] : memref<1x128xf32, #tpu.memory_space<vmem>>, vector<1x128xf32>
    %18 = vector.broadcast %17 : vector<1x128xf32> to vector<2x128xf32>
    %19 = arith.addf %16, %18 : vector<2x128xf32>
    %cst_17 = arith.constant dense<0xFF800000> : vector<2xf32>
    %20 = vector.multi_reduction <maximumf>, %19, %cst_17 [1] : vector<2x128xf32> to vector<2xf32>
    %21 = vector.shape_cast %20 : vector<2xf32> to vector<2x1xf32>
    %22 = vector.broadcast %21 : vector<2x1xf32> to vector<2x128xf32>
    %23 = arith.subf %19, %22 : vector<2x128xf32>
    %24 = math.exp %23 : vector<2x128xf32>
    %cst_18 = arith.constant 1.000000e+00 : f32
    %25 = vector.broadcast %cst_18 : f32 to vector<128x128xf32>
    %cst_19 = arith.constant dense<0.000000e+00> : vector<2x128xf32>
    %26 = tpu.matmul %24, %25, %cst_19 {dimension_numbers = #tpu.dot_dimension_numbers<[1], [0], [0], [1], [0, 0, 1, 1], [], []>} : vector<2x128xf32>, vector<128x128xf32>, vector<2x128xf32> -> vector<2x128xf32>
    %27 = vector.extract_strided_slice %24 {offsets = [0, 0], sizes = [2, 9], strides = [1, 1]} : vector<2x128xf32> to vector<2x9xf32>
    %28 = vector.extract_strided_slice %26 {offsets = [0, 0], sizes = [2, 9], strides = [1, 1]} : vector<2x128xf32> to vector<2x9xf32>
    %29 = arith.divf %27, %28 : vector<2x9xf32>
    %c0_20 = arith.constant 0 : index
    %c0_21 = arith.constant 0 : index
    %30 = vector.load %arg8[%c0_20, %c0_21] : memref<2x9xf32, #tpu.memory_space<vmem>>, vector<2x9xf32>
    tpu.vector_store %arg8[%c0_20, %c0_21], %29 {strides = array<i32>} : memref<2x9xf32, #tpu.memory_space<vmem>>, vector<2x9xf32>,
    return
  }
  func.func @transform_0(%arg0: i32) -> (i32, i32) {
    %c0_i32 = arith.constant 0 : i32
    %c0_i32_0 = arith.constant 0 : i32
    return %arg0, %c0_i32 : i32, i32
  }
  func.func @transform_1(%arg0: i32) -> (i32, i32) {
    %c0_i32 = arith.constant 0 : i32
    %c0_i32_0 = arith.constant 0 : i32
    %c0_i32_1 = arith.constant 0 : i32
    return %c0_i32, %c0_i32_0 : i32, i32
  }
  func.func @transform_2(%arg0: i32) -> (i32, i32) {
    %c0_i32 = arith.constant 0 : i32
    %c0_i32_0 = arith.constant 0 : i32
    %c0_i32_1 = arith.constant 0 : i32
    return %c0_i32, %c0_i32_0 : i32, i32
  }
  func.func @transform_3(%arg0: i32) -> (i32, i32) {
    %c0_i32 = arith.constant 0 : i32
    %c0_i32_0 = arith.constant 0 : i32
    %c0_i32_1 = arith.constant 0 : i32
    return %c0_i32, %c0_i32_0 : i32, i32
  }
  func.func @transform_4(%arg0: i32) -> (i32, i32) {
    %c0_i32 = arith.constant 0 : i32
    %c0_i32_0 = arith.constant 0 : i32
    %c0_i32_1 = arith.constant 0 : i32
    return %c0_i32, %c0_i32_0 : i32, i32
  }
  func.func @transform_5(%arg0: i32) -> (i32, i32) {
    %c0_i32 = arith.constant 0 : i32
    %c0_i32_0 = arith.constant 0 : i32
    %c0_i32_1 = arith.constant 0 : i32
    return %c0_i32, %c0_i32_0 : i32, i32
  }
  func.func @transform_6(%arg0: i32) -> (i32, i32) {
    %c0_i32 = arith.constant 0 : i32
    %c0_i32_0 = arith.constant 0 : i32
    %c0_i32_1 = arith.constant 0 : i32
    return %c0_i32, %c0_i32_0 : i32, i32
  }
  func.func @transform_7(%arg0: i32) -> (i32, i32) {
    %c0_i32 = arith.constant 0 : i32
    %c0_i32_0 = arith.constant 0 : i32
    return %arg0, %c0_i32 : i32, i32
  }
}

</mosaic_0001>

<bundles_post_ra>
// kernel: nn_forward.1
= control target key start
LH: loop header
LB: loop body
LE: loop exit
PB: predicated region body
PF: predicated region fallthrough
CT: control target
= control target key end

     0   :  { %12 = vsyncpa [#allocation3], 0  ;;  %s990_s0 = inlined_call_operand.hbm [shape: f32[2,9], index: 0, kind: input, shape index: {}]   ;;  %s991_s1 = inlined_call_operand.hbm [shape: f32[9,128], index: 1, kind: input, shape index: {}]   ;;  %s992_s2 = inlined_call_operand.vmem [shape: f32[1,128], index: 2, kind: input, shape index: {}]   ;;  %s993_s3 = inlined_call_operand.hbm [shape: f32[128,128], index: 3, kind: input, shape index: {}]   ;;  %s994_s4 = inlined_call_operand.vmem [shape: f32[1,128], index: 4, kind: input, shape index: {}]   ;;  %s995_s5 = inlined_call_operand.hbm [shape: f32[128,128], index: 5, kind: input, shape index: {}]   ;;  %s996_s6 = inlined_call_operand.vmem [shape: f32[1,128], index: 6, kind: input, shape index: {}]   ;;  %s997_s7 = inlined_call_operand.hbm [shape: f32[2,9], index: 7, kind: output, shape index: {}]  }
   0x1   :  { %13 = vsyncpa [#allocation6], 0 }
   0x2   :  { %14 = vsyncpa [#allocation9], 0 }
   0x3   :  { %15 = vsyncpa [#allocation4], 0  ;;  %s827_s24 = smov [#allocation5]   ;;  %s709_s28 = scalar_lea.hbm %s991_s1, 256 }
   0x4   :  { %s31_s25 = sshll.u32 %s827_s24, 4  ;;  %p710_p0 = scmp.ne.s32.totalorder %s991_s1, %s709_s28  ;;  %s32_s25 = int_to_ptr.vmem [resolvable:$true] %s31_s25 }
   0x5   :  { %p713_p1 = scmp.lt.u32.totalorder %s709_s28, %s991_s1 }
   0x7   :  { %p715_p2 = pnand %p713_p1, %p710_p0 }
   0x9   :  { %718 = shalt.err (!%p715_p2)
}
   0xa   :  { %s719_s10 = scalar_lea.vmem %s32_s25, 256  ;;  %p724_p4 = scmp.lt.s32.totalorder %s32_s25, %s32_s25 }
   0xb   :  { %p720_p3 = scmp.ne.s32.totalorder %s32_s25, %s719_s10  ;;  %p725_p5 = scmp.lt.s32.totalorder %s719_s10, %s719_s10 }
   0xd   :  { %p726_p6 = por %p725_p5, %p724_p4 }
   0xf   :  { %p727_p7 = pnand %p726_p6, %p720_p3 }
  0x11   :  { %730 = shalt.err (!%p727_p7)
}
  0x12   :  { %s828_s11 = smov 128   ;;  %s829_s12 = smov 8  }
  0x13   :  { %37 = dma.hbm_to_vmem [thread:$0]  %s991_s1, 256, %s32_s25, [#allocation6], %s828_s11, %s828_s11, %s829_s12  }
  0x14   :  { %s830_s15 = smov [#allocation2]   ;;  %s831_s17 = smov [#allocation7]  }
  0x15   :  { %s22_s16 = sshll.u32 %s830_s15, 4  ;;  %s45_s18 = sshll.u32 %s831_s17, 4  ;;  %s23_s16 = int_to_ptr.vmem [resolvable:$true] %s22_s16  ;;  %s46_s18 = int_to_ptr.vmem [resolvable:$true] %s45_s18 }
  0x16   :  { %s731_s21 = scalar_lea.hbm %s990_s0, 32 }
  0x17   :  { %p732_p8 = scmp.ne.s32.totalorder %s990_s0, %s731_s21  ;;  %p735_p9 = scmp.lt.u32.totalorder %s731_s21, %s990_s0 }
  0x19   :  { %p737_p10 = pnand %p735_p9, %p732_p8 }
  0x1b   :  { %740 = shalt.err (!%p737_p10)
}
  0x1c   :  { %s741_s1 = scalar_lea.vmem %s23_s16, 32  ;;  %p746_p12 = scmp.lt.s32.totalorder %s23_s16, %s23_s16 }
  0x1d   :  { %p742_p11 = scmp.ne.s32.totalorder %s23_s16, %s741_s1  ;;  %p747_p13 = scmp.lt.s32.totalorder %s741_s1, %s741_s1 }
  0x1f   :  { %p748_p0 = por %p747_p13, %p746_p12 }
  0x21   :  { %p749_p1 = pnand %p748_p0, %p742_p11 }
  0x23   :  { %752 = shalt.err (!%p749_p1)
}
  0x24   :  { %25 = dma.hbm_to_vmem [thread:$0]  %s990_s0, 32, %s23_s16, [#allocation3]  }
  0x25   :  { %s753_s30 = scalar_lea.hbm %s993_s3, 2048 }
  0x26   :  { %p754_p2 = scmp.ne.s32.totalorder %s993_s3, %s753_s30  ;;  %p757_p3 = scmp.lt.u32.totalorder %s753_s30, %s993_s3 }
  0x28   :  { %p759_p4 = pnand %p757_p3, %p754_p2 }
  0x2a   :  { %762 = shalt.err (!%p759_p4)
}
  0x2b   :  { %s763_s14 = scalar_lea.vmem %s46_s18, 2048  ;;  %p768_p6 = scmp.lt.s32.totalorder %s46_s18, %s46_s18 }
  0x2c   :  { %p764_p5 = scmp.ne.s32.totalorder %s46_s18, %s763_s14  ;;  %p769_p7 = scmp.lt.s32.totalorder %s763_s14, %s763_s14 }
  0x2e   :  { %p770_p8 = por %p769_p7, %p768_p6 }
  0x30   :  { %p771_p9 = pnand %p770_p8, %p764_p5 }
  0x32   :  { %774 = shalt.err (!%p771_p9)
}
  0x33   :  { %51 = dma.hbm_to_vmem [thread:$0]  %s993_s3, 2048, %s46_s18, [#allocation6], %s828_s11, %s828_s11, %s829_s12  }
  0x34   :  { %s832_s16 = smov [#allocation8]   ;;  %s775_s21 = scalar_lea.hbm %s995_s5, 2048 }
  0x35   :  { %s59_s17 = sshll.u32 %s832_s16, 4  ;;  %p776_p10 = scmp.ne.s32.totalorder %s995_s5, %s775_s21  ;;  %s60_s17 = int_to_ptr.vmem [resolvable:$true] %s59_s17 }
  0x36   :  { %p779_p11 = scmp.lt.u32.totalorder %s775_s21, %s995_s5 }
  0x38   :  { %p781_p12 = pnand %p779_p11, %p776_p10 }
  0x3a   :  { %784 = shalt.err (!%p781_p12)
}
  0x3b   :  { %s785_s1 = scalar_lea.vmem %s60_s17, 2048  ;;  %p790_p0 = scmp.lt.s32.totalorder %s60_s17, %s60_s17 }
  0x3c   :  { %p786_p13 = scmp.ne.s32.totalorder %s60_s17, %s785_s1  ;;  %p791_p1 = scmp.lt.s32.totalorder %s785_s1, %s785_s1 }
  0x3e   :  { %p792_p2 = por %p791_p1, %p790_p0 }
  0x40   :  { %p793_p3 = pnand %p792_p2, %p786_p13 }
  0x42   :  { %796 = shalt.err (!%p793_p3)
}
  0x43   :  { %65 = dma.hbm_to_vmem [thread:$0]  %s995_s5, 2048, %s60_s17, [#allocation9], %s828_s11, %s828_s11, %s829_s12  }
  0x44   :  { %819 = dma.done.wait [#allocation3], 32  }
  0x45   :  { %820 = vsyncadd [#allocation3], 4294967264 }
  0x46   :  { %821 = dma.done.wait [#allocation6], 2304  }
  0x47   :  { %822 = vsyncadd [#allocation6], 4294964992 }
  0x48   :  { %823 = dma.done.wait [#allocation9], 2048  }
  0x49   :  { %824 = vsyncadd [#allocation9], 4294965248  ;;  %v833_v0 = vmov 0.0|0.0   ;;  %vm834_vm0 = vmmov 0   ;;  %v835_v1 = vmov 0.0   ;;  %vm94_vm1 = vcmask 1040384  }
  0x4a   :  { %625 = vmatprep.subr.bf16.mxu0 %v833_v0  ;;  %629 = vmatprep.subr.bf16.mxu1 %v833_v0  ;;  %v81_v2 = vld [vmem:[#allocation5] sm:$0xff]  ;;  %v82_v3 = vld [vmem:[#allocation5 + $0x8] sm:$0x1]  ;;  %vm836_vm2 = vmmov 1   ;;  %v169_v5 = vld [vmem:[#allocation7] sm:$0xff]  ;;  %vm90_vm4 = vcmask 72704  }
  0x4b   :  { %517 = vmatprep.mubr.msk.f32.mxu0 %vm834_vm0, %v835_v1  ;;  %552 = vmatprep.mubr.msk.f32.mxu1 %vm834_vm0, %v835_v1  ;;  %vm627_vm3 = vmpackc.low %vm94_vm1, %vm836_vm2  ;;  %v626_v4 = vpack.c.bf16 %v82_v3, %v81_v2  ;;  %v170_v6 = vld [vmem:[#allocation7 + $0x8] sm:$0xff]  ;;  %v171_v7 = vld [vmem:[#allocation7 + $0x10] sm:$0xff]  ;;  %v837_v2 = vmov 1.0|1.0   ;;  %vm356_vm5 = vcmask 1041408   ;;  %s838_s27 = smov [#allocation10]  }
  0x4c   :  { %v630_v8 = vpack.c.bf16 %v170_v6, %v169_v5  ;;  %v172_v9 = vld [vmem:[#allocation7 + $0x18] sm:$0xff]  ;;  %v80_v10 = vld [vmem:[#allocation2] sm:$0x3]  ;;  %v173_v12 = vld [vmem:[#allocation7 + $0x20] sm:$0xff]  ;;  %s443_s28 = sshll.u32 %s838_s27, 4  ;;  %vm435_vm6 = vcmask 66560   ;;  %s444_s28 = int_to_ptr.vmem [resolvable:$true] %s443_s28 }
  0x4d   :  { %628 = vmatpush3.bf16.msk.msra.mxu0 %vm627_vm3, %v626_v4  ;;  %v633_v11 = vpack.c.bf16 %v172_v9, %v171_v7  ;;  %v174_v13 = vld [vmem:[#allocation7 + $0x28] sm:$0xff]  ;;  %v175_v15 = vld [vmem:[#allocation7 + $0x30] sm:$0xff]  ;;  %v176_v16 = vld [vmem:[#allocation7 + $0x38] sm:$0xff]  ;;  %p802_p5 = scmp.lt.s32.totalorder %s444_s28, %s444_s28 }
  0x4e   :  { %631 = vmatpush3.bf16.msra.mxu1 %v630_v8  ;;  %653 = vmatprep.subr.bf16.mxu0 %v833_v0  ;;  %v636_v14 = vpack.c.bf16 %v174_v13, %v173_v12  ;;  %v639_v17 = vpack.c.bf16 %v176_v16, %v175_v15  ;;  %v177_v18 = vld [vmem:[#allocation7 + $0x40] sm:$0xff]  ;;  %v178_v19 = vld [vmem:[#allocation7 + $0x48] sm:$0xff]  ;;  %v179_v21 = vld [vmem:[#allocation7 + $0x50] sm:$0xff] }
  0x4f   :  { %632 = vmatprep.subr.bf16.mxu1 %v833_v0  ;;  %v642_v20 = vpack.c.bf16 %v178_v19, %v177_v18  ;;  %v180_v22 = vld [vmem:[#allocation7 + $0x58] sm:$0xff]  ;;  %v181_v24 = vld [vmem:[#allocation7 + $0x60] sm:$0xff]  ;;  %v182_v25 = vld [vmem:[#allocation7 + $0x68] sm:$0xff] }
  0x50   :  { %518 = vmatmul.mubr.msk.f32.vlgmr.msra.gmra.mrb[0].mxu0 %vm90_vm4, %v80_v10  ;;  %v645_v23 = vpack.c.bf16 %v180_v22, %v179_v21  ;;  %v648_v26 = vpack.c.bf16 %v182_v25, %v181_v24  ;;  %v183_v27 = vld [vmem:[#allocation7 + $0x70] sm:$0xff]  ;;  %v184_v28 = vld [vmem:[#allocation7 + $0x78] sm:$0xff]  ;;  %v263_v30 = vld [vmem:[#allocation8] sm:$0xff] }
  0x51   :  { %587 = vmatprep.mubr.msk.f32.mxu0 %vm834_vm0, %v835_v1  ;;  %v651_v29 = vpack.c.bf16 %v184_v28, %v183_v27  ;;  %v264_v31 = vld [vmem:[#allocation8 + $0x8] sm:$0xff]  ;;  %v265_v32 = vld [vmem:[#allocation8 + $0x10] sm:$0xff]  ;;  %v266_v34 = vld [vmem:[#allocation8 + $0x18] sm:$0xff] }
  0x52   :  { %634 = vmatpush3.bf16.msra.mxu1 %v633_v11  ;;  %v654_v33 = vpack.c.bf16 %v264_v31, %v263_v30  ;;  %v657_v35 = vpack.c.bf16 %v266_v34, %v265_v32  ;;  %v267_v36 = vld [vmem:[#allocation8 + $0x20] sm:$0xff]  ;;  %v268_v37 = vld [vmem:[#allocation8 + $0x28] sm:$0xff]  ;;  %v269_v39 = vld [vmem:[#allocation8 + $0x30] sm:$0xff] }
  0x53   :  { %635 = vmatprep.subr.bf16.mxu1 %v833_v0  ;;  %v660_v38 = vpack.c.bf16 %v268_v37, %v267_v36  ;;  %v270_v40 = vld [vmem:[#allocation8 + $0x38] sm:$0xff]  ;;  %v271_v42 = vld [vmem:[#allocation8 + $0x40] sm:$0xff]  ;;  %v272_v43 = vld [vmem:[#allocation8 + $0x48] sm:$0xff] }
  0x54   :  { %655 = vmatpush3.bf16.msra.mxu0 %v654_v33  ;;  %v663_v41 = vpack.c.bf16 %v270_v40, %v269_v39  ;;  %v666_v44 = vpack.c.bf16 %v272_v43, %v271_v42  ;;  %v273_v45 = vld [vmem:[#allocation8 + $0x50] sm:$0xff]  ;;  %v274_v46 = vld [vmem:[#allocation8 + $0x58] sm:$0xff]  ;;  %v275_v48 = vld [vmem:[#allocation8 + $0x60] sm:$0xff] }
  0x55   :  { %656 = vmatprep.subr.bf16.mxu0 %v833_v0  ;;  %v669_v47 = vpack.c.bf16 %v274_v46, %v273_v45  ;;  %v276_v49 = vld [vmem:[#allocation8 + $0x68] sm:$0xff]  ;;  %v277_v56 = vld [vmem:[#allocation8 + $0x70] sm:$0xff]  ;;  %v278_v57 = vld [vmem:[#allocation8 + $0x78] sm:$0xff] }
  0x56   :  { %637 = vmatpush3.bf16.msra.mxu1 %v636_v14  ;;  %v672_v50 = vpack.c.bf16 %v276_v49, %v275_v48  ;;  %v454_v51 = vld [vmem:[%s992_s2] ss:$0 sm:$0xff]  ;;  %v675_v58 = vpack.c.bf16 %v278_v57, %v277_v56 }
  0x57   :  { %638 = vmatprep.subr.bf16.mxu1 %v833_v0  ;;  %v457_v59 = vld [vmem:[%s994_s4] ss:$0 sm:$0xff] }
  0x58   :  { %658 = vmatpush3.bf16.msra.mxu0 %v657_v35 }
  0x59   :  { %659 = vmatprep.subr.bf16.mxu0 %v833_v0 }
  0x5a   :  { %640 = vmatpush3.bf16.msra.mxu1 %v639_v17 }
  0x5b   :  { %641 = vmatprep.subr.bf16.mxu1 %v833_v0 }
  0x5c   :  { %661 = vmatpush3.bf16.msra.mxu0 %v660_v38 }
  0x5d   :  { %662 = vmatprep.subr.bf16.mxu0 %v833_v0 }
  0x5e   :  { %643 = vmatpush3.bf16.msra.mxu1 %v642_v20 }
  0x5f   :  { %644 = vmatprep.subr.bf16.mxu1 %v833_v0 }
  0x60   :  { %664 = vmatpush3.bf16.msra.mxu0 %v663_v41 }
  0x61   :  { %665 = vmatprep.subr.bf16.mxu0 %v833_v0 }
  0x62   :  { %646 = vmatpush3.bf16.msra.mxu1 %v645_v23 }
  0x63   :  { %647 = vmatprep.subr.bf16.mxu1 %v833_v0 }
  0x64   :  { %667 = vmatpush3.bf16.msra.mxu0 %v666_v44 }
  0x65   :  { %668 = vmatprep.subr.bf16.mxu0 %v833_v0 }
  0x66   :  { %649 = vmatpush3.bf16.msra.mxu1 %v648_v26 }
  0x67   :  { %650 = vmatprep.subr.bf16.mxu1 %v833_v0 }
  0x68   :  { %670 = vmatpush3.bf16.msra.mxu0 %v669_v47 }
  0x69   :  { %671 = vmatprep.subr.bf16.mxu0 %v833_v0 }
  0x6a   :  { %652 = vmatpush3.bf16.msra.mxu1 %v651_v29 }
  0x6b   :  { %677 = vmatprep.subr.bf16.mxu1 %v833_v0 }
  0x6c   :  { %673 = vmatpush3.bf16.msra.mxu0 %v672_v50 }
  0x6d   :  { %674 = vmatprep.subr.bf16.mxu0 %v833_v0 }
  0x70   :  { %676 = vmatpush3.bf16.msra.mxu0 %v675_v58 }
 0x123   :  { %v164_v52 = vpop.f32.mrb[0].mxu0 }
 0x124   :  { %v165_v53 = vadd.f32 %v454_v51, %v164_v52  ;;  %v519_v54 = vpop.f32.mrb[1].mxu0 }
 0x126   :  { %v168_v55 = vmax.f32 %v165_v53, 0.0 }
 0x128   :  { %553 = vmatmul.mubr.f32.vlgmr.msra.gmra.mrb[0].mxu1 %v168_v55 }
 0x129   :  { %622 = vmatprep.mubr.msk.f32.mxu1 %vm834_vm0, %v835_v1  ;;  %678 = vmatpush3.bf16.msra.mxu1 %v837_v2  ;;  %v458_v1 = vld [vmem:[%s996_s6] ss:$0 sm:$0xff]  ;;  %s797_s6 = scalar_lea.vmem %s444_s28, 32 }
 0x12a   :  { %679 = vmatprep.subr.bf16.mxu1 %v833_v0  ;;  %p798_p4 = scmp.ne.s32.totalorder %s444_s28, %s797_s6  ;;  %p803_p6 = scmp.lt.s32.totalorder %s797_s6, %s797_s6 }
 0x12c   :  { %p804_p7 = por %p803_p6, %p802_p5 }
 0x12d   :  { %680 = vmatpush3.bf16.msra.mxu1 %v837_v2 }
 0x12e   :  { %681 = vmatprep.subr.bf16.mxu1 %v833_v0  ;;  %p805_p8 = pnand %p804_p7, %p798_p4 }
 0x131   :  { %682 = vmatpush3.bf16.msra.mxu1 %v837_v2 }
 0x132   :  { %683 = vmatprep.subr.bf16.mxu1 %v833_v0 }
 0x135   :  { %684 = vmatpush3.bf16.msra.mxu1 %v837_v2 }
 0x136   :  { %685 = vmatprep.subr.bf16.mxu1 %v833_v0 }
 0x139   :  { %686 = vmatpush3.bf16.msra.mxu1 %v837_v2 }
 0x13a   :  { %687 = vmatprep.subr.bf16.mxu1 %v833_v0 }
 0x13d   :  { %688 = vmatpush3.bf16.msra.mxu1 %v837_v2 }
 0x13e   :  { %689 = vmatprep.subr.bf16.mxu1 %v833_v0 }
 0x141   :  { %690 = vmatpush3.bf16.msra.mxu1 %v837_v2 }
 0x142   :  { %691 = vmatprep.subr.bf16.mxu1 %v833_v0 }
 0x145   :  { %692 = vmatpush3.bf16.msra.mxu1 %v837_v2 }
 0x1fb   :  { %v258_v60 = vpop.f32.mrb[0].mxu1 }
 0x1fc   :  { %v259_v61 = vadd.f32 %v457_v59, %v258_v60  ;;  %v554_v62 = vpop.f32.mrb[1].mxu1 }
 0x1fe   :  { %v262_v63 = vmax.f32 %v259_v61, 0.0 }
 0x200   :  { %588 = vmatmul.mubr.f32.vlgmr.msra.gmra.mrb[2].mxu0 %v262_v63 }
 0x2d3   :  { %v352_v3 = vpop.f32.mrb[2].mxu0 }
 0x2d4   :  { %v353_v4 = vadd.f32 %v458_v1, %v352_v3  ;;  %v589_v5 = vpop.f32.mrb[3].mxu0 }
 0x2d6   :  { %v357_v6 = vsel %vm356_vm5, %v353_v4, -inf }
 0x2d7   :  { %358 = vmax.xlane.f32.xlu0 %v357_v6 }
 0x364   :  { %v359_v7 = vpop.xlane.xlu0 %358 }
 0x365   :  { %v360_v8 = vsub.f32 %v353_v4, %v359_v7 }
 0x367   :  { %v361_v9 = vmul.f32 1.442695, %v360_v8 }
 0x369   :  { %705 = vpow2.f32 %v361_v9 }
 0x373   :  { %v706_v10 = vpop.eup %705 }
 0x374   :  { %623 = vmatmul.mubr.f32.vlgmr.msra.gmra.mrb[2].mxu1 %v706_v10 }
 0x447   :  { %v429_v11 = vpop.f32.mrb[2].mxu1 }
 0x448   :  { %707 = vrcp.f32 %v429_v11  ;;  %v624_v0 = vpop.f32.mrb[3].mxu1 }
 0x452   :  { %v708_v12 = vpop.eup %707 }
 0x453   :  { %v434_v13 = vmul.f32 %v708_v12, %v706_v10 }
 0x455   :  { %436 = vst.msk [vmem:[#allocation10] sm:$0x3] %vm435_vm6, %v434_v13 }
 0x456   :  { %808 = shalt.err (!%p805_p8)
}
 0x457   :  { %s809_s8 = scalar_lea.hbm %s997_s7, 32 }
 0x458   :  { %p810_p9 = scmp.ne.s32.totalorder %s997_s7, %s809_s8  ;;  %p813_p10 = scmp.lt.u32.totalorder %s809_s8, %s997_s7 }
 0x45a   :  { %p815_p11 = pnand %p813_p10, %p810_p9 }
 0x45c   :  { %818 = shalt.err (!%p815_p11)
}
 0x45d   :  { %446 = dma.vmem_to_hbm [thread:$0]  %s444_s28, 32, %s997_s7, [#allocation4]  }
 0x45e   :  { %825 = dma.done.wait [#allocation4], 32  }
 0x45f   :  { %826 = vsyncadd [#allocation4], 4294967264 }
 0x460   :  { %450 = vsyncpa [#allocation3], 1 }
 0x461   :  { %451 = vsyncpa [#allocation6], 1 }
 0x462   :  { %452 = vsyncpa [#allocation9], 1 }
 0x463   :  { %453 = vsyncpa [#allocation4], 1 }

</bundles_post_ra>
